<compile_context>
chip_gen: v5e
topology: v5e:2x2
jax: 0.10.0
libtpu: 0.0.40
codegen_flags: <defaults>
</compile_context>

<pallas_src>
import functools

import jax
import jax.numpy as jnp
from jax.experimental import pallas as pl
from jax.experimental.pallas import tpu as pltpu

LANES = 128


def _round_up(x, m):
    return ((x + m - 1) // m) * m


def _pick_block(B, G, N_pad, budget_bytes=12 * 1024 * 1024):
    """Pick samples-per-tile SB (and padded batch size) so resident VMEM stays small."""
    # f32 bytes per sample row: double-buffered phase + mask blocks plus a few
    # row-sized temporaries (cos, sin, mask*cos products).
    per_row = 4 * N_pad * (2 * (1 + G) + 4) + 4 * (G + 2)
    sb = min(512, max(8, budget_bytes // max(per_row, 1)))
    sb = max(8, (sb // 8) * 8)
    if B <= sb:
        return B, B          # block == full batch dim (exempt from the /8 rule)
    return sb, _round_up(B, sb)


def _criterion_kernel(ph_ref, m_ref, invn_ref, w_ref, out_ref):
    """One (batch-tile, t) grid step.

    ph_ref  : (SB, N_pad)      phases for this batch tile at time t
    m_ref   : (G, SB, N_pad)   group masks (resident across t)
    invn_ref: (G, SB, 1)       1 / max(group size, 1) (resident across t)
    w_ref   : (SB, 1)          (t+1)^degree / B  per sample (0 for padded rows)
    out_ref : (8, LANES)       per-batch-tile weighted-loss accumulator
    """
    t = pl.program_id(1)

    @pl.when(t == 0)
    def _():
        out_ref[...] = jnp.zeros_like(out_ref)

    ph = ph_ref[...]                                   # (SB, N)
    cosv = jnp.cos(ph)
    sinv = jnp.sin(ph)

    num_groups = m_ref.shape[0]
    sb = ph.shape[0]
    within_sum = jnp.zeros((sb, 1), jnp.float32)
    cn_sum = jnp.zeros((sb, 1), jnp.float32)
    sn_sum = jnp.zeros((sb, 1), jnp.float32)

    # Static unrolled loop over the (small) number of groups; each iteration is a
    # dense (SB, N_pad) multiply + lane reduction.
    for g in range(num_groups):
        mg = m_ref[g]                                  # (SB, N)
        inv_g = invn_ref[g]                            # (SB, 1)
        cg = jnp.sum(mg * cosv, axis=-1, keepdims=True) * inv_g
        sg = jnp.sum(mg * sinv, axis=-1, keepdims=True) * inv_g
        within_sum = within_sum + cg * cg + sg * sg
        cn_sum = cn_sum + cg
        sn_sum = sn_sum + sg

    total = cn_sum * cn_sum + sn_sum * sn_sum          # sum over all (g,h) pairs
    cross = total - within_sum                         # sum over g != h
    denom = float(num_groups * (num_groups - 1)) if num_groups > 1 else 1.0
    loss = (1.0 - within_sum * (1.0 / num_groups)) + cross * (1.0 / denom)  # (SB, 1)

    # Fold batch mean and (t+1)^degree weighting: weighted sum over the tile's rows.
    contrib = jnp.sum(loss * w_ref[...], axis=0, keepdims=True)             # (1, 1)
    out_ref[...] = out_ref[...] + jnp.broadcast_to(contrib, out_ref.shape)


@functools.partial(jax.jit, static_argnames=("T", "degree"))
def criterion_forward(phases_cat, mask, *, T, degree):
    """Mirrors criterion.forward.

    phases_cat: (T*B, N)  == torch.cat(phase_list, dim=0), sample s = t*B + b
    mask      : (B, G, N) soft/binary group masks
    returns   : (1,) float32 (matches torch.matmul((T,), (T,1)))
    """
    B, G, N = mask.shape
    N_pad = _round_up(N, LANES)
    SB, B_pad = _pick_block(B, G, N_pad)
    num_b = B_pad // SB

    # phases: (T, B_pad, N_pad)
    ph = phases_cat.astype(jnp.float32).reshape(T, B, N)
    ph = jnp.pad(ph, ((0, 0), (0, B_pad - B), (0, N_pad - N)))

    # mask: (G, B_pad, N_pad)  -- lane-dense layout, resident across t in the kernel
    m = mask.astype(jnp.float32)
    m_t = jnp.transpose(m, (1, 0, 2))
    m_t = jnp.pad(m_t, ((0, 0), (0, B_pad - B), (0, N_pad - N)))

    # 1 / group size, precomputed once (same for every t): (G, B_pad, 1)
    inv_n = 1.0 / jnp.maximum(m.sum(-1), 1.0)          # (B, G)
    inv_n = jnp.pad(jnp.transpose(inv_n), ((0, 0), (0, B_pad - B)))
    inv_n = inv_n.reshape(G, B_pad, 1)

    # Combined per-(t, sample) weight: (t+1)^degree / B, zero on padded rows.
    w_time = jnp.power(jnp.arange(T, dtype=jnp.float32) + 1.0, float(degree))  # (T,)
    row_w = jnp.where(jnp.arange(B_pad) < B, 1.0 / B, 0.0).astype(jnp.float32)
    w_comb = (w_time[:, None] * row_w[None, :]).reshape(T, B_pad, 1)

    out = pl.pallas_call(
        _criterion_kernel,
        out_shape=jax.ShapeDtypeStruct((num_b * 8, LANES), jnp.float32),
        grid=(num_b, T),
        in_specs=[
            pl.BlockSpec((None, SB, N_pad), lambda b, t: (t, b, 0)),   # phases
            pl.BlockSpec((G, SB, N_pad), lambda b, t: (0, b, 0)),      # mask (t-invariant)
            pl.BlockSpec((G, SB, 1), lambda b, t: (0, b, 0)),          # 1/n   (t-invariant)
            pl.BlockSpec((None, SB, 1), lambda b, t: (t, b, 0)),       # weights
        ],
        out_specs=pl.BlockSpec((8, LANES), lambda b, t: (b, 0)),
        compiler_params=pltpu.CompilerParams(
            dimension_semantics=("parallel", "arbitrary"),
            vmem_limit_bytes=32 * 1024 * 1024,
        ),
    )(ph, m_t, inv_n, w_comb)

    total = jnp.sum(out.reshape(num_b, 8, LANES)[:, 0, 0])
    return total.reshape(1)


def _reference(phases_cat, mask, T, degree):
    """Pure-JAX reference of the same math (sanity check)."""
    B, G, N = mask.shape
    ph = phases_cat.astype(jnp.float32).reshape(T, B, N)
    m = mask.astype(jnp.float32)
    c = jnp.einsum("bgn,tbn->tbg", m, jnp.cos(ph))
    s = jnp.einsum("bgn,tbn->tbg", m, jnp.sin(ph))
    n = jnp.maximum(m.sum(-1), 1.0)                    # (B, G)
    cn, sn = c / n[None], s / n[None]
    within = cn * cn + sn * sn                         # (T, B, G)
    total = cn.sum(-1) ** 2 + sn.sum(-1) ** 2
    cross = total - within.sum(-1)
    denom = float(G * (G - 1)) if G > 1 else 1.0
    loss = (1.0 - within.mean(-1)) + cross / denom     # (T, B)
    loss = loss.mean(1)                                # (T,)
    w = jnp.power(jnp.arange(T, dtype=jnp.float32) + 1.0, float(degree))[:, None]
    return jnp.matmul(loss, w)                         # (1,)


def _make_inputs(key, T, B, G, N):
    k_ph, k_grp = jax.random.split(key)
    phase_list = [
        jax.random.uniform(jax.random.fold_in(k_ph, t), (B, N),
                           dtype=jnp.float32, minval=0.0, maxval=2.0 * jnp.pi)
        for t in range(T)
    ]
    assign = jax.random.randint(k_grp, (B, N), 0, G)
    mask = jax.nn.one_hot(assign, G, axis=1, dtype=jnp.float32)   # (B, G, N)
    phases_cat = jnp.concatenate(phase_list, axis=0)              # (T*B, N)
    return phases_cat, mask


if __name__ == "__main__":
    key = jax.random.PRNGKey(0)

    # Config 1: matches the torch module's typical use (T time steps, batch, groups).
    T, B, G, N, degree = 3, 2, 4, 64, 2
    phases_cat, mask = _make_inputs(key, T, B, G, N)
    out = criterion_forward(phases_cat, mask, T=T, degree=degree)
    out = jax.block_until_ready(out)
    ref = _reference(phases_cat, mask, T, degree)
    assert out.shape == (1,), out.shape
    assert jnp.allclose(out, ref, rtol=2e-3, atol=2e-3), (out, ref)

    # Config 2: non-multiple-of-8 batch and non-multiple-of-128 oscillator count
    # to exercise the padding / masking paths.
    T2, B2, G2, N2, degree2 = 2, 5, 3, 50, 3
    phases_cat2, mask2 = _make_inputs(jax.random.PRNGKey(1), T2, B2, G2, N2)
    out2 = criterion_forward(phases_cat2, mask2, T=T2, degree=degree2)
    out2 = jax.block_until_ready(out2)
    ref2 = _reference(phases_cat2, mask2, T2, degree2)
    assert out2.shape == (1,), out2.shape
    assert jnp.allclose(out2, ref2, rtol=2e-3, atol=2e-3), (out2, ref2)

    print("KERNEL_OK")
</pallas_src>

<mosaic_0001>
module attributes {stable_mosaic.version = 11 : i64} {
  func.func @_criterion_kernel(%arg0: i32, %arg1: i32, %arg2: memref<1x2x128xf32, #tpu.memory_space<vmem>>, %arg3: memref<4x2x128xf32, #tpu.memory_space<vmem>>, %arg4: memref<4x2x1xf32, #tpu.memory_space<vmem>>, %arg5: memref<1x2x1xf32, #tpu.memory_space<vmem>>, %arg6: memref<8x128xf32, #tpu.memory_space<vmem>>) attributes {dimension_semantics = [#tpu.dimension_semantics<parallel>, #tpu.dimension_semantics<arbitrary>], iteration_bounds = array<i64: 1, 3>, scalar_prefetch = 0 : i64, scratch_operands = 0 : i64, tpu.core_type = #tpu.core_type<tc>, window_params = [{transform_indices = @transform_0, window_bounds = array<i64: 1, 2, 128>}, {transform_indices = @transform_1, window_bounds = array<i64: 4, 2, 128>}, {transform_indices = @transform_2, window_bounds = array<i64: 4, 2, 1>}, {transform_indices = @transform_3, window_bounds = array<i64: 1, 2, 1>}, {transform_indices = @transform_4, window_bounds = array<i64: 8, 128>}]} {
    %c0_i32 = arith.constant 0 : i32
    %0 = arith.cmpi eq, %arg1, %c0_i32 : i32
    %1 = arith.extui %0 : i1 to i32
    %c0_i32_0 = arith.constant 0 : i32
    %2 = arith.cmpi ne, %1, %c0_i32_0 : i32
    scf.if %2 {
      %cst_45 = arith.constant 0.000000e+00 : f32
      %103 = vector.broadcast %cst_45 : f32 to vector<8x128xf32>
      %c0_46 = arith.constant 0 : index
      %c0_47 = arith.constant 0 : index
      %104 = vector.load %arg6[%c0_46, %c0_47] : memref<8x128xf32, #tpu.memory_space<vmem>>, vector<8x128xf32>
      tpu.vector_store %arg6[%c0_46, %c0_47], %103 {strides = array<i32>} : memref<8x128xf32, #tpu.memory_space<vmem>>, vector<8x128xf32>,
    } else {
    }
    %c0 = arith.constant 0 : index
    %c0_1 = arith.constant 0 : index
    %c0_2 = arith.constant 0 : index
    %3 = vector.load %arg2[%c0, %c0_1, %c0_2] : memref<1x2x128xf32, #tpu.memory_space<vmem>>, vector<1x2x128xf32>
    %4 = vector.shape_cast %3 : vector<1x2x128xf32> to vector<2x128xf32>
    %5 = math.cos %4 : vector<2x128xf32>
    %6 = math.sin %4 : vector<2x128xf32>
    %cst = arith.constant 0.000000e+00 : f32
    %7 = vector.broadcast %cst : f32 to vector<2x1xf32>
    %cst_3 = arith.constant 0.000000e+00 : f32
    %8 = vector.broadcast %cst_3 : f32 to vector<2x1xf32>
    %cst_4 = arith.constant 0.000000e+00 : f32
    %9 = vector.broadcast %cst_4 : f32 to vector<2x1xf32>
    %c0_5 = arith.constant 0 : index
    %c0_6 = arith.constant 0 : index
    %c0_7 = arith.constant 0 : index
    %10 = vector.load %arg3[%c0_5, %c0_6, %c0_7] : memref<4x2x128xf32, #tpu.memory_space<vmem>>, vector<1x2x128xf32>
    %11 = vector.shape_cast %10 : vector<1x2x128xf32> to vector<2x128xf32>
    %c0_8 = arith.constant 0 : index
    %c0_9 = arith.constant 0 : index
    %c0_10 = arith.constant 0 : index
    %12 = vector.load %arg4[%c0_8, %c0_9, %c0_10] : memref<4x2x1xf32, #tpu.memory_space<vmem>>, vector<1x2x1xf32>
    %13 = vector.shape_cast %12 : vector<1x2x1xf32> to vector<2x1xf32>
    %14 = arith.mulf %11, %5 : vector<2x128xf32>
    %cst_11 = arith.constant dense<0.000000e+00> : vector<2xf32>
    %15 = vector.multi_reduction <add>, %14, %cst_11 [1] : vector<2x128xf32> to vector<2xf32>
    %16 = vector.shape_cast %15 : vector<2xf32> to vector<2x1xf32>
    %17 = arith.mulf %16, %13 : vector<2x1xf32>
    %18 = arith.mulf %11, %6 : vector<2x128xf32>
    %cst_12 = arith.constant dense<0.000000e+00> : vector<2xf32>
    %19 = vector.multi_reduction <add>, %18, %cst_12 [1] : vector<2x128xf32> to vector<2xf32>
    %20 = vector.shape_cast %19 : vector<2xf32> to vector<2x1xf32>
    %21 = arith.mulf %20, %13 : vector<2x1xf32>
    %22 = arith.mulf %17, %17 : vector<2x1xf32>
    %23 = arith.addf %7, %22 : vector<2x1xf32>
    %24 = arith.mulf %21, %21 : vector<2x1xf32>
    %25 = arith.addf %23, %24 : vector<2x1xf32>
    %26 = arith.addf %8, %17 : vector<2x1xf32>
    %27 = arith.addf %9, %21 : vector<2x1xf32>
    %c1 = arith.constant 1 : index
    %c0_13 = arith.constant 0 : index
    %c0_14 = arith.constant 0 : index
    %28 = vector.load %arg3[%c1, %c0_13, %c0_14] : memref<4x2x128xf32, #tpu.memory_space<vmem>>, vector<1x2x128xf32>
    %29 = vector.shape_cast %28 : vector<1x2x128xf32> to vector<2x128xf32>
    %c1_15 = arith.constant 1 : index
    %c0_16 = arith.constant 0 : index
    %c0_17 = arith.constant 0 : index
    %30 = vector.load %arg4[%c1_15, %c0_16, %c0_17] : memref<4x2x1xf32, #tpu.memory_space<vmem>>, vector<1x2x1xf32>
    %31 = vector.shape_cast %30 : vector<1x2x1xf32> to vector<2x1xf32>
    %32 = arith.mulf %29, %5 : vector<2x128xf32>
    %cst_18 = arith.constant dense<0.000000e+00> : vector<2xf32>
    %33 = vector.multi_reduction <add>, %32, %cst_18 [1] : vector<2x128xf32> to vector<2xf32>
    %34 = vector.shape_cast %33 : vector<2xf32> to vector<2x1xf32>
    %35 = arith.mulf %34, %31 : vector<2x1xf32>
    %36 = arith.mulf %29, %6 : vector<2x128xf32>
    %cst_19 = arith.constant dense<0.000000e+00> : vector<2xf32>
    %37 = vector.multi_reduction <add>, %36, %cst_19 [1] : vector<2x128xf32> to vector<2xf32>
    %38 = vector.shape_cast %37 : vector<2xf32> to vector<2x1xf32>
    %39 = arith.mulf %38, %31 : vector<2x1xf32>
    %40 = arith.mulf %35, %35 : vector<2x1xf32>
    %41 = arith.addf %25, %40 : vector<2x1xf32>
    %42 = arith.mulf %39, %39 : vector<2x1xf32>
    %43 = arith.addf %41, %42 : vector<2x1xf32>
    %44 = arith.addf %26, %35 : vector<2x1xf32>
    %45 = arith.addf %27, %39 : vector<2x1xf32>
    %c2 = arith.constant 2 : index
    %c0_20 = arith.constant 0 : index
    %c0_21 = arith.constant 0 : index
    %46 = vector.load %arg3[%c2, %c0_20, %c0_21] : memref<4x2x128xf32, #tpu.memory_space<vmem>>, vector<1x2x128xf32>
    %47 = vector.shape_cast %46 : vector<1x2x128xf32> to vector<2x128xf32>
    %c2_22 = arith.constant 2 : index
    %c0_23 = arith.constant 0 : index
    %c0_24 = arith.constant 0 : index
    %48 = vector.load %arg4[%c2_22, %c0_23, %c0_24] : memref<4x2x1xf32, #tpu.memory_space<vmem>>, vector<1x2x1xf32>
    %49 = vector.shape_cast %48 : vector<1x2x1xf32> to vector<2x1xf32>
    %50 = arith.mulf %47, %5 : vector<2x128xf32>
    %cst_25 = arith.constant dense<0.000000e+00> : vector<2xf32>
    %51 = vector.multi_reduction <add>, %50, %cst_25 [1] : vector<2x128xf32> to vector<2xf32>
    %52 = vector.shape_cast %51 : vector<2xf32> to vector<2x1xf32>
    %53 = arith.mulf %52, %49 : vector<2x1xf32>
    %54 = arith.mulf %47, %6 : vector<2x128xf32>
    %cst_26 = arith.constant dense<0.000000e+00> : vector<2xf32>
    %55 = vector.multi_reduction <add>, %54, %cst_26 [1] : vector<2x128xf32> to vector<2xf32>
    %56 = vector.shape_cast %55 : vector<2xf32> to vector<2x1xf32>
    %57 = arith.mulf %56, %49 : vector<2x1xf32>
    %58 = arith.mulf %53, %53 : vector<2x1xf32>
    %59 = arith.addf %43, %58 : vector<2x1xf32>
    %60 = arith.mulf %57, %57 : vector<2x1xf32>
    %61 = arith.addf %59, %60 : vector<2x1xf32>
    %62 = arith.addf %44, %53 : vector<2x1xf32>
    %63 = arith.addf %45, %57 : vector<2x1xf32>
    %c3 = arith.constant 3 : index
    %c0_27 = arith.constant 0 : index
    %c0_28 = arith.constant 0 : index
    %64 = vector.load %arg3[%c3, %c0_27, %c0_28] : memref<4x2x128xf32, #tpu.memory_space<vmem>>, vector<1x2x128xf32>
    %65 = vector.shape_cast %64 : vector<1x2x128xf32> to vector<2x128xf32>
    %c3_29 = arith.constant 3 : index
    %c0_30 = arith.constant 0 : index
    %c0_31 = arith.constant 0 : index
    %66 = vector.load %arg4[%c3_29, %c0_30, %c0_31] : memref<4x2x1xf32, #tpu.memory_space<vmem>>, vector<1x2x1xf32>
    %67 = vector.shape_cast %66 : vector<1x2x1xf32> to vector<2x1xf32>
    %68 = arith.mulf %65, %5 : vector<2x128xf32>
    %cst_32 = arith.constant dense<0.000000e+00> : vector<2xf32>
    %69 = vector.multi_reduction <add>, %68, %cst_32 [1] : vector<2x128xf32> to vector<2xf32>
    %70 = vector.shape_cast %69 : vector<2xf32> to vector<2x1xf32>
    %71 = arith.mulf %70, %67 : vector<2x1xf32>
    %72 = arith.mulf %65, %6 : vector<2x128xf32>
    %cst_33 = arith.constant dense<0.000000e+00> : vector<2xf32>
    %73 = vector.multi_reduction <add>, %72, %cst_33 [1] : vector<2x128xf32> to vector<2xf32>
    %74 = vector.shape_cast %73 : vector<2xf32> to vector<2x1xf32>
    %75 = arith.mulf %74, %67 : vector<2x1xf32>
    %76 = arith.mulf %71, %71 : vector<2x1xf32>
    %77 = arith.addf %61, %76 : vector<2x1xf32>
    %78 = arith.mulf %75, %75 : vector<2x1xf32>
    %79 = arith.addf %77, %78 : vector<2x1xf32>
    %80 = arith.addf %62, %71 : vector<2x1xf32>
    %81 = arith.addf %63, %75 : vector<2x1xf32>
    %82 = arith.mulf %80, %80 : vector<2x1xf32>
    %83 = arith.mulf %81, %81 : vector<2x1xf32>
    %84 = arith.addf %82, %83 : vector<2x1xf32>
    %85 = arith.subf %84, %79 : vector<2x1xf32>
    %cst_34 = arith.constant 2.500000e-01 : f32
    %86 = vector.broadcast %cst_34 : f32 to vector<2x1xf32>
    %87 = arith.mulf %79, %86 : vector<2x1xf32>
    %cst_35 = arith.constant 1.000000e+00 : f32
    %88 = vector.broadcast %cst_35 : f32 to vector<2x1xf32>
    %89 = arith.subf %88, %87 : vector<2x1xf32>
    %cst_36 = arith.constant 0.0833333358 : f32
    %90 = vector.broadcast %cst_36 : f32 to vector<2x1xf32>
    %91 = arith.mulf %85, %90 : vector<2x1xf32>
    %92 = arith.addf %89, %91 : vector<2x1xf32>
    %c0_37 = arith.constant 0 : index
    %c0_38 = arith.constant 0 : index
    %c0_39 = arith.constant 0 : index
    %93 = vector.load %arg5[%c0_37, %c0_38, %c0_39] : memref<1x2x1xf32, #tpu.memory_space<vmem>>, vector<1x2x1xf32>
    %94 = vector.shape_cast %93 : vector<1x2x1xf32> to vector<2x1xf32>
    %95 = arith.mulf %92, %94 : vector<2x1xf32>
    %cst_40 = arith.constant dense<0.000000e+00> : vector<1xf32>
    %96 = vector.multi_reduction <add>, %95, %cst_40 [0] : vector<2x1xf32> to vector<1xf32>
    %97 = vector.shape_cast %96 : vector<1xf32> to vector<1x1xf32>
    %c0_41 = arith.constant 0 : index
    %c0_42 = arith.constant 0 : index
    %98 = vector.load %arg6[%c0_41, %c0_42] : memref<8x128xf32, #tpu.memory_space<vmem>>, vector<8x128xf32>
    %99 = vector.shape_cast %97 : vector<1x1xf32> to vector<1x1xf32>
    %100 = vector.broadcast %99 : vector<1x1xf32> to vector<8x128xf32>
    %101 = arith.addf %98, %100 : vector<8x128xf32>
    %c0_43 = arith.constant 0 : index
    %c0_44 = arith.constant 0 : index
    %102 = vector.load %arg6[%c0_43, %c0_44] : memref<8x128xf32, #tpu.memory_space<vmem>>, vector<8x128xf32>
    tpu.vector_store %arg6[%c0_43, %c0_44], %101 {strides = array<i32>} : memref<8x128xf32, #tpu.memory_space<vmem>>, vector<8x128xf32>,
    return
  }
  func.func @transform_0(%arg0: i32, %arg1: i32) -> (i32, i32, i32) {
    %c0_i32 = arith.constant 0 : i32
    %c0_i32_0 = arith.constant 0 : i32
    return %arg1, %arg0, %c0_i32 : i32, i32, i32
  }
  func.func @transform_1(%arg0: i32, %arg1: i32) -> (i32, i32, i32) {
    %c0_i32 = arith.constant 0 : i32
    %c0_i32_0 = arith.constant 0 : i32
    %c0_i32_1 = arith.constant 0 : i32
    return %c0_i32, %arg0, %c0_i32_0 : i32, i32, i32
  }
  func.func @transform_2(%arg0: i32, %arg1: i32) -> (i32, i32, i32) {
    %c0_i32 = arith.constant 0 : i32
    %c0_i32_0 = arith.constant 0 : i32
    %c0_i32_1 = arith.constant 0 : i32
    return %c0_i32, %arg0, %c0_i32_0 : i32, i32, i32
  }
  func.func @transform_3(%arg0: i32, %arg1: i32) -> (i32, i32, i32) {
    %c0_i32 = arith.constant 0 : i32
    %c0_i32_0 = arith.constant 0 : i32
    return %arg1, %arg0, %c0_i32 : i32, i32, i32
  }
  func.func @transform_4(%arg0: i32, %arg1: i32) -> (i32, i32) {
    %c0_i32 = arith.constant 0 : i32
    %c0_i32_0 = arith.constant 0 : i32
    return %arg0, %c0_i32 : i32, i32
  }
}

</mosaic_0001>

<bundles_post_ra>
// kernel: criterion_forward.1
= control target key start
LH: loop header
LB: loop body
LE: loop exit
PB: predicated region body
PF: predicated region fallthrough
CT: control target
= control target key end

     0   :  { %s920_s15 = smov 0   ;;  %s922_s16 = smov 0   ;;  %s1049_s0 = inlined_call_operand.vmem [shape: f32[3,2,128], index: 0, kind: input, shape index: {}]   ;;  %s1050_s1 = inlined_call_operand.vmem [shape: f32[4,2,128], index: 1, kind: input, shape index: {}]   ;;  %s1051_s2 = inlined_call_operand.vmem [shape: f32[4,2,1], index: 2, kind: input, shape index: {}]   ;;  %s1052_s3 = inlined_call_operand.vmem [shape: f32[3,2,1], index: 3, kind: input, shape index: {}]   ;;  %s1053_s4 = inlined_call_operand.vmem [shape: f32[8,128], index: 4, kind: output, shape index: {}]  }
   0x1   :  { %s924_s17 = smov 0  }
   0x2 LB: > { %s23_s18 = sadd.s32 1, %s881_s16  ;;  %p810_p0 = scmp.ge.s32.totalorder %s885_s17, 1  ;;  %s885_s17 = sphi %s924_s17, %s14_s17   ;;  %s881_s16 = sphi %s922_s16, %s1055_s16   ;;  %s877_s15 = sphi %s920_s15, %s1054_s15  }
   0x3   : > { %p24_p1 = scmp.ge.s32.totalorder %s23_s18, 3  ;;  %p210_p2 = scmp.lt.s32.totalorder %s885_s17, 4 }
   0x5   : > { %s1057_s18 = smov (%p24_p1, %s23_s18), 0  ;;  %p211_p3 = pnand %p810_p0, %p210_p2 }
   0x6   : > { %p252_p4 = scmp.lt.s32.totalorder (!%p211_p3), %s877_s15, 2  ;;  %p813_p5 = scmp.ne.s32.totalorder (!%p211_p3), %s877_s15, 0 }
   0x7   : > { %214 = sbr.rel (%p211_p3) target bundleno = 377 (0x179), region = 36 }
   0xc   : > { %s253_s19 = scalar_select %p252_p4, %s877_s15, 2 }
   0xd   : > { %281 = sbr.rel (%p813_p5) target bundleno = 20 (0x14), region = 40 }
   0xe   : > { %s811_s20 = sshll.u32 %s253_s19, 1 }
   0xf   : > { %s258_s23 = scalar_lea.vmem %s1049_s0, %s811_s20  ;;  %s944_s26 = scalar_lea.vmem %s1052_s3, %s811_s20 }
  0x12   : > { %v887_v0 = vmov 0.0  }
  0x13   : > { %282 = vst [vmem:[%s1053_s4] sm:$0xff] %v887_v0 }
  0x14 PF: > { %v949_v1 = vld [vmem:[%s258_s23] sm:$0x3]  ;;  %v888_v5 = vmov 0   ;;  %v889_v14 = vmov 683565275  }
  0x15   : > { %v287_v2 = vand.u32 2139095040, %v949_v1  ;;  %v284_v4 = vand.u32 2147483647, %v949_v1  ;;  %861 = vset.pattern.permute.xlu2 %v888_v5  ;;  %862 = vset.pattern.permute.xlu0 %v888_v5  ;;  %v890_v16 = vmov 2475754826   ;;  %vm286_vm12 = vcmp.lt.s32.totalorder %v949_v1, 0 }
  0x16   : > { %v891_v18 = vmov 2131351028   ;;  %v892_v20 = vmov 2102212464   ;;  %v893_v22 = vmov 920167782  }
  0x17   : > { %v288_v3 = vshrl.u32 %v287_v2, 23  ;;  %v291_v8 = vand.u32 8388607, %v284_v4  ;;  %v894_v28 = vmov 1326507024  }
  0x18   : > { %vm285_vm13 = vcmp.le.f32.partialorder %v284_v4, 0.7853982 }
  0x19   : > { %v814_v6 = vadd.s32 4294967169, %v288_v3  ;;  %v292_v11 = vor.u32 8388608, %v291_v8 }
  0x1b   : > { %v294_v7 = vadd.s32 1, %v814_v6  ;;  %v960_v30 = vshll.u32 %v292_v11, 8 }
  0x1d   : > { %vm295_vm0 = vcmp.gt.s32.totalorder %v294_v7, 0  ;;  %v333_v42 = vand.u32 65535, %v960_v30  ;;  %v334_v43 = vshrl.u32 %v960_v30, 16 }
  0x1e   : > { %v296_v9 = vsel %vm295_vm0, %v294_v7, 0 }
  0x1f   : > { %v298_v10 = vand.u32 31, %v296_v9  ;;  %v957_v12 = vshrl.u32 %v296_v9, 5 }
  0x21   : > { %v299_v13 = vsub.s32 32, %v298_v10  ;;  %v301_v15 = vshll.u32 %v889_v14, %v298_v10  ;;  %v304_v17 = vshll.u32 %v890_v16, %v298_v10  ;;  %v307_v19 = vshll.u32 %v891_v18, %v298_v10 }
  0x22   : > { %v310_v21 = vshll.u32 %v892_v20, %v298_v10  ;;  %v313_v23 = vshll.u32 %v893_v22, %v298_v10  ;;  %vm316_vm1 = vcmp.lt.s32.totalorder %v957_v12, 1  ;;  %vm319_vm2 = vcmp.lt.s32.totalorder %v957_v12, 4 }
  0x23   : > { %v302_v24 = vshrl.u32 %v890_v16, %v299_v13  ;;  %v305_v25 = vshrl.u32 %v891_v18, %v299_v13  ;;  %v308_v26 = vshrl.u32 %v892_v20, %v299_v13  ;;  %v311_v27 = vshrl.u32 %v893_v22, %v299_v13 }
  0x24   : > { %v314_v29 = vshrl.u32 %v894_v28, %v299_v13  ;;  %vm318_vm3 = vcmp.lt.s32.totalorder %v957_v12, 3  ;;  %vm317_vm4 = vcmp.lt.s32.totalorder %v957_v12, 2  ;;  %v300_v50 = vshrl.u32 %v889_v14, %v299_v13 }
  0x25   : > { %v303_v31 = vor.u32 %v302_v24, %v301_v15  ;;  %v306_v32 = vor.u32 %v305_v25, %v304_v17  ;;  %v309_v33 = vor.u32 %v308_v26, %v307_v19  ;;  %v312_v34 = vor.u32 %v311_v27, %v310_v21 }
  0x26   : > { %v315_v35 = vor.u32 %v314_v29, %v313_v23 }
  0x27   : > { %v324_v36 = vsel %vm316_vm1, %v303_v31, %v306_v32  ;;  %v328_v37 = vsel %vm316_vm1, %v306_v32, %v309_v33  ;;  %v325_v38 = vsel %vm319_vm2, %v312_v34, 920167782  ;;  %v320_v63 = vsel %vm316_vm1, %v300_v50, %v303_v31 }
  0x28   : > { %v329_v39 = vsel %vm319_vm2, %v315_v35, 1326507024  ;;  %v326_v40 = vsel %vm318_vm3, %v309_v33, %v325_v38  ;;  %v321_v2 = vsel %vm319_vm2, %v309_v33, 2102212464 }
  0x29   : > { %v330_v41 = vsel %vm318_vm3, %v312_v34, %v329_v39  ;;  %v327_v44 = vsel %vm317_vm4, %v324_v36, %v326_v40  ;;  %v322_v14 = vsel %vm318_vm3, %v306_v32, %v321_v2 }
  0x2a   : > { %v331_v45 = vsel %vm317_vm4, %v328_v37, %v330_v41  ;;  %v357_v48 = vand.u32 65535, %v327_v44  ;;  %v358_v49 = vshrl.u32 %v327_v44, 16  ;;  %v323_v22 = vsel %vm317_vm4, %v320_v63, %v322_v14 }
  0x2b   : > { %v335_v46 = vand.u32 65535, %v331_v45  ;;  %v336_v47 = vshrl.u32 %v331_v45, 16  ;;  %v377_v26 = vmul.u32 %v960_v30, %v323_v22  ;;  %vm427_vm4 = vweird.f32 %v949_v1 }
  0x2c   : > { %v359_v54 = vmul.u32 %v357_v48, %v333_v42  ;;  %v360_v55 = vmul.u32 %v358_v49, %v333_v42  ;;  %v361_v56 = vmul.u32 %v357_v48, %v334_v43  ;;  %v362_v60 = vmul.u32 %v358_v49, %v334_v43 }
  0x2d   : > { %v337_v51 = vmul.u32 %v335_v46, %v333_v42  ;;  %v338_v52 = vmul.u32 %v336_v47, %v333_v42  ;;  %v339_v53 = vmul.u32 %v335_v46, %v334_v43  ;;  %v340_v57 = vmul.u32 %v336_v47, %v334_v43 }
  0x2e   : > { %v363_v61 = vshll.u32 %v360_v55, 16  ;;  %v365_v62 = vshll.u32 %v361_v56, 16  ;;  %v364_v11 = vshrl.u32 %v360_v55, 16  ;;  %v366_v18 = vshrl.u32 %v361_v56, 16 }
  0x2f   : > { %v341_v58 = vshll.u32 %v338_v52, 16  ;;  %v343_v59 = vshll.u32 %v339_v53, 16  ;;  %v342_v7 = vshrl.u32 %v338_v52, 16  ;;  %v344_v15 = vshrl.u32 %v339_v53, 16 }
  0x30   : > { %vm367_vm6 = vc.u32 %v359_v54, %v363_v61  ;;  %v369_v6 = vadd.s32 %v363_v61, %v359_v54 }
  0x31   : > { %vm345_vm5 = vc.u32 %v337_v51, %v341_v58  ;;  %v347_v0 = vadd.s32 %v341_v58, %v337_v51  ;;  %v368_v9 = vsel %vm367_vm6, 1, %v888_v5  ;;  %vm682_vm6 = vcmask 1024  }
  0x32   : > { %v346_v3 = vsel %vm345_vm5, 1, %v888_v5  ;;  %v370_v13 = vadd.s32 %v368_v9, %v362_v60  ;;  %vm371_vm8 = vc.u32 %v369_v6, %v365_v62  ;;  %v373_v21 = vadd.s32 %v369_v6, %v365_v62 }
  0x33   : > { %v348_v8 = vadd.s32 %v346_v3, %v340_v57  ;;  %vm349_vm7 = vc.u32 %v347_v0, %v343_v59  ;;  %v372_v17 = vsel %vm371_vm8, 1, %v888_v5  ;;  %vm596_vm5 = vcmask 1041408  }
  0x34   : > { %v350_v10 = vsel %vm349_vm7, 1, %v888_v5  ;;  %v374_v19 = vadd.s32 %v372_v17, %v370_v13  ;;  %v593_v17 = vld [vmem:[%s1050_s1] sm:$0x3] }
  0x35   : > { %v352_v16 = vadd.s32 %v350_v10, %v348_v8 }
  0x36   : > { %v375_v23 = vadd.s32 %v374_v19, %v364_v11 }
  0x37   : > { %v353_v20 = vadd.s32 %v352_v16, %v342_v7  ;;  %v820_v16 = vld [vmem:[%s1050_s1 + $0x2] sm:$0x3] }
  0x38   : > { %v376_v25 = vadd.s32 %v375_v23, %v366_v18  ;;  %v822_v18 = vld [vmem:[%s1050_s1 + $0x4] sm:$0x3] }
  0x39   : > { %v354_v24 = vadd.s32 %v353_v20, %v344_v15 }
  0x3a   : > { %v380_v27 = vadd.s32 1, %v376_v25 }
  0x3b   : > { %vm379_vm9 = vc.u32 %v354_v24, %v373_v21  ;;  %v378_v12 = vadd.s32 %v373_v21, %v354_v24 }
  0x3c   : > { %v381_v28 = vsel %vm379_vm9, %v380_v27, %v376_v25 }
  0x3d   : > { %v382_v29 = vadd.s32 %v381_v28, %v377_v26 }
  0x3f   : > { %v383_v31 = vadd.s32 536870912, %v382_v29 }
  0x41   : > { %v384_v32 = vshrl.u32 %v383_v31, 30 }
  0x43   : > { %v385_v33 = vshll.u32 %v384_v32, 30  ;;  %v408_v50 = vsub.s32 4, %v384_v32 }
  0x45   : > { %v386_v5 = vsub.s32 %v382_v29, %v385_v33  ;;  %v409_v54 = vsel %vm286_vm12, %v408_v50, %v384_v32 }
  0x46   : > { %v411_v57 = vsel %vm285_vm13, 0, %v409_v54 }
  0x47   : > { %vm387_vm10 = vcmp.lt.s32.totalorder %v386_v5, 0  ;;  %v388_v34 = vsub.s32 0, %v386_v5  ;;  %v582_v60 = vadd.s32 3, %v411_v57  ;;  %v428_v2 = vand.u32 3, %v411_v57 }
  0x49   : > { %v389_v35 = vsel %vm387_vm10, %v388_v34, %v386_v5  ;;  %v583_v3 = vand.u32 3, %v582_v60  ;;  %vm433_vm14 = vcmp.eq.s32.totalorder %v428_v2, 2  ;;  %vm429_vm0 = vcmp.lt.s32.totalorder %v428_v2, 2 }
  0x4a   : > { %v390_v36 = vclz %v389_v35  ;;  %vm430_vm1 = vcmp.eq.s32.totalorder %v428_v2, 0  ;;  %v824_v35 = vld [vmem:[%s1050_s1 + $0x6] sm:$0x3] }
  0x4b   : > { %vm588_vm15 = vcmp.eq.s32.totalorder %v583_v3, 2  ;;  %vm585_vm2 = vcmp.eq.s32.totalorder %v583_v3, 0  ;;  %vm584_vm3 = vcmp.lt.s32.totalorder %v583_v3, 2 }
  0x4c   : > { %v815_v37 = vadd.s32 4294967294, %v390_v36 }
  0x4e   : > { %vm816_vm11 = vcmp.lt.s32.totalorder %v815_v37, 0 }
  0x4f   : > { %v393_v38 = vsel %vm816_vm11, 0, %v815_v37 }
  0x50   : > { %v394_v39 = vsub.s32 32, %v393_v38  ;;  %v395_v40 = vshll.u32 %v386_v5, %v393_v38  ;;  %v398_v41 = vsub.s32 4294967266, %v393_v38 }
  0x52   : > { %v396_v30 = vshrl.u32 %v378_v12, %v394_v39  ;;  %v399_v42 = vadd.s32 127, %v398_v41 }
  0x54   : > { %v397_v43 = vor.u32 %v396_v30, %v395_v40  ;;  %v400_v44 = vshll.u32 %v399_v42, 23  ;;  %v594_v30 = vld [vmem:[%s1051_s2] sm:$0x3]  ;;  %v821_v42 = vld [vmem:[%s1051_s2 + $0x2] sm:$0x3] }
  0x56   : > { %v401_v45 = vor.u32 4788187, %v400_v44  ;;  %v404_v46 = vcvt.s32.f32 %v397_v43 }
  0x58   : > { %v402_v47 = vand.u32 2147483647, %v401_v45 }
  0x5a   : > { %v405_v48 = vmul.f32 %v404_v46, %v402_v47 }
  0x5c   : > { %v406_v49 = vxor.u32 2147483648, %v405_v48 }
  0x5e   : > { %v407_v51 = vsel %vm286_vm12, %v406_v49, %v405_v48 }
  0x5f   : > { %v410_v52 = vsel %vm285_vm13, %v949_v1, %v407_v51  ;;  %v823_v51 = vld [vmem:[%s1051_s2 + $0x4] sm:$0x3] }
  0x60   : > { %v412_v53 = vmul.f32 %v410_v52, %v410_v52 }
  0x62   : > { %v413_v55 = vmul.f32 -0.001358992, %v412_v53  ;;  %v420_v56 = vmul.f32 -0.00019511016, %v412_v53 }
  0x64   : > { %v414_v58 = vadd.f32 0.041655596, %v413_v55  ;;  %v421_v59 = vadd.f32 0.008332121, %v420_v56 }
  0x66   : > { %v415_v61 = vmul.f32 %v414_v58, %v412_v53  ;;  %v422_v62 = vmul.f32 %v421_v59, %v412_v53  ;;  %v825_v59 = vld [vmem:[%s1051_s2 + $0x6] sm:$0x3] }
  0x68   : > { %v416_v63 = vadd.f32 -0.4999988, %v415_v61  ;;  %v423_v0 = vadd.f32 -0.16666654, %v422_v62 }
  0x6a   : > { %v417_v4 = vmul.f32 %v416_v63, %v412_v53  ;;  %v424_v6 = vmul.f32 %v423_v0, %v412_v53 }
  0x6c   : > { %v418_v7 = vadd.f32 1.0, %v417_v4  ;;  %v425_v8 = vadd.f32 1.0, %v424_v6 }
  0x6e   : > { %v426_v9 = vmul.f32 %v425_v8, %v410_v52  ;;  %v434_v10 = vxor.u32 2147483648, %v418_v7 }
  0x70   : > { %v431_v11 = vxor.u32 2147483648, %v426_v9  ;;  %v435_v13 = vsel %vm433_vm14, %v434_v10, %v426_v9  ;;  %v590_v14 = vsel %vm588_vm15, %v434_v10, %v426_v9 }
  0x72   : > { %v432_v15 = vsel %vm430_vm1, %v418_v7, %v431_v11  ;;  %v587_v19 = vsel %vm585_vm2, %v418_v7, %v431_v11 }
  0x73   : > { %v436_v20 = vsel %vm429_vm0, %v432_v15, %v435_v13  ;;  %v591_v21 = vsel %vm584_vm3, %v587_v19, %v590_v14 }
  0x74   : > { %v437_v22 = vsel %vm427_vm4, nan, %v436_v20  ;;  %v592_v25 = vsel %vm427_vm4, nan, %v591_v21 }
  0x75   : > { %v616_v23 = vmul.f32 %v820_v16, %v437_v22  ;;  %v595_v1 = vmul.f32 %v593_v17, %v437_v22  ;;  %v636_v24 = vmul.f32 %v822_v18, %v437_v22  ;;  %v621_v29 = vmul.f32 %v820_v16, %v592_v25 }
  0x76   : > { %v601_v31 = vmul.f32 %v593_v17, %v592_v25  ;;  %v641_v32 = vmul.f32 %v822_v18, %v592_v25  ;;  %v661_v36 = vmul.f32 %v824_v35, %v592_v25  ;;  %v656_v37 = vmul.f32 %v824_v35, %v437_v22 }
  0x77   : > { %v617_v26 = vsel %vm596_vm5, %v616_v23, 0.0  ;;  %v597_v27 = vsel %vm596_vm5, %v595_v1, 0.0  ;;  %v637_v28 = vsel %vm596_vm5, %v636_v24, 0.0  ;;  %v622_v33 = vsel %vm596_vm5, %v621_v29, 0.0  ;;  %v680_v24 = vld [vmem:[%s944_s26] sm:$0x3] }
  0x78   : > { %618 = vadd.xlane.f32.xlu1 %v617_v26  ;;  %598 = vadd.xlane.f32.xlu0 %v597_v27  ;;  %v602_v5 = vsel %vm596_vm5, %v601_v31, 0.0  ;;  %v642_v34 = vsel %vm596_vm5, %v641_v32, 0.0  ;;  %v662_v12 = vsel %vm596_vm5, %v661_v36, 0.0  ;;  %v657_v38 = vsel %vm596_vm5, %v656_v37, 0.0 }
  0x79   : > { %638 = vadd.xlane.f32.xlu2 %v637_v28 }
  0x80   : > { %623 = vadd.xlane.f32.xlu1 %v622_v33  ;;  %603 = vadd.xlane.f32.xlu0 %v602_v5 }
  0x81   : > { %643 = vadd.xlane.f32.xlu2 %v642_v34  ;;  %v690_v34 = vld [vmem:[%s1053_s4] sm:$0xff] }
  0x88   : > { %663 = vadd.xlane.f32.xlu1 %v662_v12  ;;  %658 = vadd.xlane.f32.xlu0 %v657_v38 }
  0xeb   : > { %v619_v39 = vpop.xlane.xlu1 %618  ;;  %v599_v40 = vpop.xlane.xlu0 %598 }
  0xec   : > { %v639_v41 = vpop.xlane.xlu2 %638  ;;  %v600_v43 = vmul.f32 %v599_v40, %v594_v30  ;;  %v620_v48 = vmul.f32 %v821_v42, %v619_v39 }
  0xed   : > { %v640_v58 = vmul.f32 %v823_v51, %v639_v41 }
  0xee   : > { %v606_v50 = vmul.f32 %v600_v43, %v600_v43  ;;  %v626_v53 = vmul.f32 %v620_v48, %v620_v48  ;;  %v630_v57 = vadd.f32 %v620_v48, %v600_v43 }
  0xef   : > { %v646_v62 = vmul.f32 %v640_v58, %v640_v58 }
  0xf0   : > { %v650_v8 = vadd.f32 %v640_v58, %v630_v57 }
  0xf3   : > { %v624_v44 = vpop.xlane.xlu1 %623  ;;  %v604_v45 = vpop.xlane.xlu0 %603 }
  0xf4   : > { %v625_v46 = vmul.f32 %v821_v42, %v624_v44  ;;  %v605_v47 = vmul.f32 %v604_v45, %v594_v30  ;;  %v644_v49 = vpop.xlane.xlu2 %643 }
  0xf5   : > { %v645_v56 = vmul.f32 %v823_v51, %v644_v49 }
  0xf6   : > { %v608_v52 = vmul.f32 %v605_v47, %v605_v47  ;;  %v631_v55 = vadd.f32 %v625_v46, %v605_v47  ;;  %v628_v60 = vmul.f32 %v625_v46, %v625_v46 }
  0xf7   : > { %v648_v63 = vmul.f32 %v645_v56, %v645_v56 }
  0xf8   : > { %v609_v54 = vadd.f32 %v608_v52, %v606_v50  ;;  %v651_v4 = vadd.f32 %v645_v56, %v631_v55 }
  0xfa   : > { %v627_v61 = vadd.f32 %v626_v53, %v609_v54 }
  0xfb   : > { %v664_v0 = vpop.xlane.xlu1 %663  ;;  %v659_v2 = vpop.xlane.xlu0 %658 }
  0xfc   : > { %v629_v3 = vadd.f32 %v628_v60, %v627_v61  ;;  %v665_v6 = vmul.f32 %v825_v59, %v664_v0  ;;  %v660_v7 = vmul.f32 %v825_v59, %v659_v2 }
  0xfe   : > { %v647_v9 = vadd.f32 %v646_v62, %v629_v3  ;;  %v671_v10 = vadd.f32 %v665_v6, %v651_v4  ;;  %v666_v11 = vmul.f32 %v660_v7, %v660_v7  ;;  %v670_v13 = vadd.f32 %v660_v7, %v650_v8 }
  0xff   : > { %v668_v17 = vmul.f32 %v665_v6, %v665_v6 }
 0x100   : > { %v649_v14 = vadd.f32 %v648_v63, %v647_v9  ;;  %v673_v15 = vmul.f32 %v671_v10, %v671_v10  ;;  %v672_v16 = vmul.f32 %v670_v13, %v670_v13 }
 0x102   : > { %v667_v18 = vadd.f32 %v666_v11, %v649_v14  ;;  %v674_v20 = vadd.f32 %v673_v15, %v672_v16 }
 0x104   : > { %v669_v19 = vadd.f32 %v668_v17, %v667_v18 }
 0x106   : > { %v675_v21 = vsub.f32 %v674_v20, %v669_v19  ;;  %v676_v22 = vmul.f32 0.25, %v669_v19 }
 0x108   : > { %v677_v23 = vsub.f32 1.0, %v676_v22  ;;  %v678_v1 = vmul.f32 0.083333336, %v675_v21 }
 0x10a   : > { %v679_v25 = vadd.f32 %v678_v1, %v677_v23 }
 0x10c   : > { %v681_v26 = vmul.f32 %v680_v24, %v679_v25 }
 0x10e   : > { %v683_v27 = vsel %vm682_vm6, %v681_v26, 0.0 }
 0x10f   : > { %v684_v28 = vrot.slane %v683_v27, 4 }
 0x111   : > { %v685_v29 = vadd.f32 %v684_v28, %v683_v27 }
 0x113   : > { %v686_v31 = vrot.slane %v685_v29, 2 }
 0x115   : > { %v687_v32 = vadd.f32 %v686_v31, %v685_v29 }
 0x117   : > { %v688_v33 = vrot.slane %v687_v32, 1 }
 0x119   : > { %v689_v5 = vadd.f32 %v688_v33, %v687_v32 }
 0x11b   : > { %693 = vperm.xlu2 %861, %v689_v5  }
 0x175   : > { %v694_v35 = vpop.permute.xlu2 %693 }
 0x176   : > { %v696_v36 = vadd.f32 %v694_v35, %v690_v34 }
 0x178   : > { %697 = vst [vmem:[%s1053_s4] sm:$0xff] %v696_v36 }
 0x179 PF: > { %s14_s17 = sadd.s32 1, %s885_s17   ;;  %s1054_s15 = smov %s881_s16 }
 0x17a   : > { %p11_p6 = scmp.ge.s32.totalorder %s14_s17, 5   ;;  %s1055_s16 = smov %s1057_s18 }
 0x17c   :  { %13 = sbr.rel (!%p11_p6) target bundleno = 2 (0x2), region = 85 }

</bundles_post_ra>
